<compile_context>
chip_gen: v6e
topology: v6e:2x2x1
jax: 0.10.0
libtpu: 0.0.40
codegen_flags: <defaults>
</compile_context>

<pallas_src>
import jax
import jax.numpy as jnp
from jax.experimental import pallas as pl
from jax.experimental.pallas import tpu as pltpu

# Module hyper-parameters (consistent with the torch __init__)
NUM_STEPS_INPUT = 16
N_INSTRUMENTS = 4
C_OUT = 64
K = NUM_STEPS_INPUT // 2 + 1            # conv kernel size = 9
L_OUT = NUM_STEPS_INPUT - K + 1         # conv output length = 8
HIDDEN = 32

X_COLS = N_INSTRUMENTS * NUM_STEPS_INPUT         # 64
CONV_COLS = L_OUT * C_OUT                        # 512

# packed-slab row layout (lanes = L_OUT*C_OUT = 512)
_SLAB_ROWS = 72                          # 64 W_big rows + 4 misc rows, padded to x8
_ROW_BCONV = 64                          # tiled conv bias (all 512 lanes)
_ROW_B1 = 65                             # linear bias      (first 32 lanes)
_ROW_W2 = 66                             # output weight    (first 32 lanes)
_ROW_B2 = 67                             # output bias      (lane 0)


def dqn_kernel(x_ref, slab_ref, w1_ref, out_ref):
    # x:    (B_TILE, 64)
    # slab: (72, 512)  rows 0..63 = W_big, 64 = bconv_tiled, 65 = b1, 66 = w2, 67 = b2
    # w1:   (512, 32)
    # out:  (1, B_TILE)   lane-dense (batch on the lane axis)
    x = x_ref[...]

    # conv1d + bias + ReLU as one matmul against the Toeplitz-expanded weight;
    # result is already the flattened conv output in l-major order: (B_TILE, 512)
    conv = jnp.dot(x, slab_ref[0:X_COLS, :], preferred_element_type=jnp.float32)
    conv = jnp.maximum(conv + slab_ref[_ROW_BCONV:_ROW_BCONV + 1, :], 0.0)

    # Linear(512 -> 32) + ReLU: single matmul with K=512
    h = jnp.dot(conv, w1_ref[...], preferred_element_type=jnp.float32)
    h = jnp.maximum(h + slab_ref[_ROW_B1:_ROW_B1 + 1, 0:HIDDEN], 0.0)        # (B_TILE, 32)

    # Linear(32 -> 1) as VPU multiply + lane reduction (no MXU round trip)
    w2 = slab_ref[_ROW_W2:_ROW_W2 + 1, 0:HIDDEN]                             # (1, 32)
    b2 = slab_ref[_ROW_B2:_ROW_B2 + 1, 0:1]                                  # (1, 1)
    q = jnp.sum(h * w2, axis=-1)                                             # (B_TILE,)
    out_ref[...] = q.reshape(1, -1) + b2                                     # (1, B_TILE)


def pack_params(params):
    """One-time weight re-layout (hoisted out of the per-call forward)."""
    conv_w, conv_b, lin_w, lin_b, out_w, out_b = params
    L = NUM_STEPS_INPUT

    # Toeplitz-expanded conv weight:
    #   W_big[c*L + j, l*C_OUT + o] = conv_w[o, c, j - l]   for 0 <= j - l < K
    # so that (x.reshape(B, C_in*L) @ W_big)[b, l*C_OUT + o] == conv1d(x)[b, o, l].
    w_ock = conv_w.transpose(1, 2, 0)                        # (C_in, K, C_OUT)
    wb = jnp.zeros((N_INSTRUMENTS, L, L_OUT, C_OUT), jnp.float32)
    for l in range(L_OUT):                                   # pack-time only
        wb = wb.at[:, l:l + K, l, :].set(w_ock)
    w_big = wb.reshape(N_INSTRUMENTS * L, CONV_COLS)         # (64, 512)

    slab = jnp.zeros((_SLAB_ROWS, CONV_COLS), jnp.float32)
    slab = slab.at[0:N_INSTRUMENTS * L, :].set(w_big)
    slab = slab.at[_ROW_BCONV, :].set(jnp.tile(conv_b, L_OUT))   # l-major conv bias
    slab = slab.at[_ROW_B1, 0:HIDDEN].set(lin_b)
    slab = slab.at[_ROW_W2, 0:HIDDEN].set(out_w.reshape(HIDDEN))
    slab = slab.at[_ROW_B2, 0].set(out_b[0])

    # Linear(64*L_OUT -> 32): PyTorch flat index is o*L_OUT + l (channel-major);
    # re-order rows to the kernel's l-major conv layout: row index l*C_OUT + o.
    w1_flat = (lin_w.reshape(HIDDEN, C_OUT, L_OUT)
               .transpose(2, 1, 0)
               .reshape(CONV_COLS, HIDDEN))                  # (512, 32)
    return slab, w1_flat


def _ceil_to(n, m):
    return ((n + m - 1) // m) * m


def dqn_forward_batched(x, packed, *, b_tile=512):
    """x: (B, N_INSTRUMENTS, NUM_STEPS_INPUT) float32 -> (B,) Q-values.

    Grid over batch tiles; weights use constant index_maps (VMEM-resident across
    the whole grid). B_TILE defaults to 512 (256-multiple for v6e/v7x MXU rows).
    """
    slab, w1_flat = packed
    B = x.shape[0]
    assert x.shape[1:] == (N_INSTRUMENTS, NUM_STEPS_INPUT)
    x_flat = x.reshape(B, X_COLS).astype(jnp.float32)        # free row-major reshape

    if B < b_tile:
        # single grid step: shrink the tile (must stay a multiple of 8 sublanes)
        b_tile = max(_ceil_to(B, 8), 8)
    b_pad = _ceil_to(B, b_tile)
    if b_pad != B:
        x_flat = jnp.pad(x_flat, ((0, b_pad - B), (0, 0)))
    num_tiles = b_pad // b_tile

    out = pl.pallas_call(
        dqn_kernel,
        out_shape=jax.ShapeDtypeStruct((1, b_pad), jnp.float32),
        grid=(num_tiles,),
        in_specs=[
            pl.BlockSpec((b_tile, X_COLS), lambda i: (i, 0)),        # x tile
            pl.BlockSpec((_SLAB_ROWS, CONV_COLS), lambda i: (0, 0)),  # weights: resident
            pl.BlockSpec((CONV_COLS, HIDDEN), lambda i: (0, 0)),      # weights: resident
        ],
        out_specs=pl.BlockSpec((1, b_tile), lambda i: (0, i)),        # lane-dense output
        compiler_params=pltpu.CompilerParams(
            dimension_semantics=("parallel",)),                       # both TCs on v7x
    )(x_flat, slab, w1_flat)
    return out[0, :B]


def dqn_forward(x, packed):
    """Exact module semantics: x (1, N_INSTRUMENTS, NUM_STEPS_INPUT) -> (1,)."""
    assert x.shape == (1, N_INSTRUMENTS, NUM_STEPS_INPUT)
    return dqn_forward_batched(x, packed)                    # (1,) — matches .view(1)


def ref_forward_batched(x, params):
    """Pure-JAX reference replicating the torch forward for a batch."""
    conv_w, conv_b, lin_w, lin_b, out_w, out_b = params
    c = jax.lax.conv_general_dilated(
        x, conv_w, window_strides=(1,), padding="VALID",
        dimension_numbers=("NCH", "OIH", "NCH"))
    c = jnp.maximum(c + conv_b[None, :, None], 0.0)
    flat = c.reshape(x.shape[0], -1)                          # channel-major flatten
    h = jnp.maximum(flat @ lin_w.T + lin_b[None, :], 0.0)
    o = h @ out_w.T + out_b[None, :]
    return o[:, 0]


def ref_forward(x, params):
    return ref_forward_batched(x, params).reshape(1)


def init_params(key):
    ks = jax.random.split(key, 6)
    conv_w = 0.1 * jax.random.normal(ks[0], (C_OUT, N_INSTRUMENTS, K), jnp.float32)
    conv_b = 0.1 * jax.random.normal(ks[1], (C_OUT,), jnp.float32)
    lin_w = 0.05 * jax.random.normal(ks[2], (HIDDEN, C_OUT * L_OUT), jnp.float32)
    lin_b = 0.05 * jax.random.normal(ks[3], (HIDDEN,), jnp.float32)
    out_w = 0.1 * jax.random.normal(ks[4], (1, HIDDEN), jnp.float32)
    out_b = 0.1 * jax.random.normal(ks[5], (1,), jnp.float32)
    return conv_w, conv_b, lin_w, lin_b, out_w, out_b


if __name__ == "__main__":
    key = jax.random.PRNGKey(0)
    pkey, xkey1, xkey2 = jax.random.split(key, 3)
    params = init_params(pkey)
    packed = pack_params(params)          # once, at "model load" time

    # 1) Exact module semantics: batch=1, output shape (1,)  (== .view(1))
    x1 = jax.random.normal(xkey1, (1, N_INSTRUMENTS, NUM_STEPS_INPUT), jnp.float32)
    y1 = dqn_forward(x1, packed)
    jax.block_until_ready(y1)
    y1_ref = ref_forward(x1, params)
    assert y1.shape == (1,)
    assert jnp.allclose(y1, y1_ref, rtol=1e-4, atol=1e-4), (y1, y1_ref)

    # 2) Batched throughput path: grid over 512-row tiles (exercises padding,
    #    multi-step grid, VMEM-resident weights, lane-dense output).
    B = 600
    xb = jax.random.normal(xkey2, (B, N_INSTRUMENTS, NUM_STEPS_INPUT), jnp.float32)
    yb = dqn_forward_batched(xb, packed)
    jax.block_until_ready(yb)
    yb_ref = ref_forward_batched(xb, params)
    assert yb.shape == (B,)
    assert jnp.allclose(yb, yb_ref, rtol=1e-4, atol=1e-4), float(
        jnp.max(jnp.abs(yb - yb_ref)))

    print("KERNEL_OK")
</pallas_src>

<mosaic_0001>
module attributes {stable_mosaic.version = 11 : i64} {
  func.func @dqn_kernel(%arg0: i32, %arg1: memref<8x64xf32, #tpu.memory_space<vmem>>, %arg2: memref<72x512xf32, #tpu.memory_space<vmem>>, %arg3: memref<512x32xf32, #tpu.memory_space<vmem>>, %arg4: memref<1x8xf32, #tpu.memory_space<vmem>>) attributes {dimension_semantics = [#tpu.dimension_semantics<parallel>], iteration_bounds = array<i64: 1>, scalar_prefetch = 0 : i64, scratch_operands = 0 : i64, tpu.core_type = #tpu.core_type<tc>, window_params = [{transform_indices = @transform_0, window_bounds = array<i64: 8, 64>}, {pipeline_mode = #tpu.pipeline_mode<synchronous>, transform_indices = @transform_1, window_bounds = array<i64: 72, 512>}, {pipeline_mode = #tpu.pipeline_mode<synchronous>, transform_indices = @transform_2, window_bounds = array<i64: 512, 32>}, {transform_indices = @transform_3, window_bounds = array<i64: 1, 8>}]} {
    %c0 = arith.constant 0 : index
    %c0_0 = arith.constant 0 : index
    %0 = vector.load %arg1[%c0, %c0_0] : memref<8x64xf32, #tpu.memory_space<vmem>>, vector<8x64xf32>
    %c0_1 = arith.constant 0 : index
    %c0_2 = arith.constant 0 : index
    %1 = vector.load %arg2[%c0_1, %c0_2] : memref<72x512xf32, #tpu.memory_space<vmem>>, vector<64x512xf32>
    %cst = arith.constant dense<0.000000e+00> : vector<8x512xf32>
    %2 = tpu.matmul %0, %1, %cst {dimension_numbers = #tpu.dot_dimension_numbers<[1], [0], [0], [1], [0, 0, 1, 1], [], []>} : vector<8x64xf32>, vector<64x512xf32>, vector<8x512xf32> -> vector<8x512xf32>
    %c64 = arith.constant 64 : index
    %c0_3 = arith.constant 0 : index
    %3 = vector.load %arg2[%c64, %c0_3] : memref<72x512xf32, #tpu.memory_space<vmem>>, vector<1x512xf32>
    %4 = vector.broadcast %3 : vector<1x512xf32> to vector<8x512xf32>
    %5 = arith.addf %2, %4 : vector<8x512xf32>
    %cst_4 = arith.constant 0.000000e+00 : f32
    %6 = vector.broadcast %cst_4 : f32 to vector<8x512xf32>
    %7 = arith.maximumf %5, %6 : vector<8x512xf32>
    %c0_5 = arith.constant 0 : index
    %c0_6 = arith.constant 0 : index
    %8 = vector.load %arg3[%c0_5, %c0_6] : memref<512x32xf32, #tpu.memory_space<vmem>>, vector<512x32xf32>
    %cst_7 = arith.constant dense<0.000000e+00> : vector<8x32xf32>
    %9 = tpu.matmul %7, %8, %cst_7 {dimension_numbers = #tpu.dot_dimension_numbers<[1], [0], [0], [1], [0, 0, 1, 1], [], []>} : vector<8x512xf32>, vector<512x32xf32>, vector<8x32xf32> -> vector<8x32xf32>
    %c65 = arith.constant 65 : index
    %c0_8 = arith.constant 0 : index
    %10 = vector.load %arg2[%c65, %c0_8] : memref<72x512xf32, #tpu.memory_space<vmem>>, vector<1x32xf32>
    %11 = vector.broadcast %10 : vector<1x32xf32> to vector<8x32xf32>
    %12 = arith.addf %9, %11 : vector<8x32xf32>
    %cst_9 = arith.constant 0.000000e+00 : f32
    %13 = vector.broadcast %cst_9 : f32 to vector<8x32xf32>
    %14 = arith.maximumf %12, %13 : vector<8x32xf32>
    %c66 = arith.constant 66 : index
    %c0_10 = arith.constant 0 : index
    %15 = vector.load %arg2[%c66, %c0_10] : memref<72x512xf32, #tpu.memory_space<vmem>>, vector<1x32xf32>
    %c67 = arith.constant 67 : index
    %c0_11 = arith.constant 0 : index
    %16 = vector.load %arg2[%c67, %c0_11] : memref<72x512xf32, #tpu.memory_space<vmem>>, vector<1x1xf32>
    %17 = vector.broadcast %15 : vector<1x32xf32> to vector<8x32xf32>
    %18 = arith.mulf %14, %17 : vector<8x32xf32>
    %cst_12 = arith.constant dense<0.000000e+00> : vector<8xf32>
    %19 = vector.multi_reduction <add>, %18, %cst_12 [1] : vector<8x32xf32> to vector<8xf32>
    %20 = vector.shape_cast %19 : vector<8xf32> to vector<1x8xf32>
    %21 = vector.broadcast %16 : vector<1x1xf32> to vector<1x8xf32>
    %22 = arith.addf %20, %21 : vector<1x8xf32>
    %c0_13 = arith.constant 0 : index
    %c0_14 = arith.constant 0 : index
    %23 = vector.load %arg4[%c0_13, %c0_14] : memref<1x8xf32, #tpu.memory_space<vmem>>, vector<1x8xf32>
    tpu.vector_store %arg4[%c0_13, %c0_14], %22 {strides = array<i32>} : memref<1x8xf32, #tpu.memory_space<vmem>>, vector<1x8xf32>,
    return
  }
  func.func @transform_0(%arg0: i32) -> (i32, i32) {
    %c0_i32 = arith.constant 0 : i32
    %c0_i32_0 = arith.constant 0 : i32
    return %arg0, %c0_i32 : i32, i32
  }
  func.func @transform_1(%arg0: i32) -> (i32, i32) {
    %c0_i32 = arith.constant 0 : i32
    %c0_i32_0 = arith.constant 0 : i32
    %c0_i32_1 = arith.constant 0 : i32
    return %c0_i32, %c0_i32_0 : i32, i32
  }
  func.func @transform_2(%arg0: i32) -> (i32, i32) {
    %c0_i32 = arith.constant 0 : i32
    %c0_i32_0 = arith.constant 0 : i32
    %c0_i32_1 = arith.constant 0 : i32
    return %c0_i32, %c0_i32_0 : i32, i32
  }
  func.func @transform_3(%arg0: i32) -> (i32, i32) {
    %c0_i32 = arith.constant 0 : i32
    %c0_i32_0 = arith.constant 0 : i32
    return %c0_i32, %arg0 : i32, i32
  }
}

</mosaic_0001>

<bundles_post_ra>
// kernel: tpu_custom_call.1
= control target key start
LH: loop header
LB: loop body
LE: loop exit
PB: predicated region body
PF: predicated region fallthrough
CT: control target
= control target key end

     0   :  { %vm71_vm0 = vcmask 523264   ;;  %v563_v33 = vmov 0.0   ;;  %s892_s0 = inlined_call_operand.vmem [shape: f32[8,64], index: 0, kind: input, shape index: {}]   ;;  %s893_s1 = inlined_call_operand.vmem [shape: f32[72,512], index: 1, kind: input, shape index: {}]   ;;  %s894_s2 = inlined_call_operand.vmem [shape: f32[512,32], index: 2, kind: input, shape index: {}]   ;;  %s895_s3 = inlined_call_operand.hbm [shape: f32[1,8], index: 3, kind: output, shape index: {}]  }
   0x1   :  { %v45_v0 = vld [vmem:[%s893_s1 + $0xe8] sm:$0xff]  ;;  %v47_v1 = vld [vmem:[%s893_s1 + $0xf8] sm:$0xff]  ;;  %v44_v2 = vld [vmem:[%s893_s1 + $0xe0] sm:$0xff]  ;;  %139 = vmatprep.mubr.f32.mxu0 %v563_v33  ;;  %210 = vmatprep.mubr.f32.mxu1 %v563_v33 }
   0x2   :  { %91 = vmatprep.subr.mxu0 %v45_v0  ;;  %162 = vmatprep.subr.mxu1 %v47_v1  ;;  %v46_v3 = vld [vmem:[%s893_s1 + $0xf0] sm:$0xff]  ;;  %v41_v4 = vld [vmem:[%s893_s1 + $0xc8] sm:$0xff]  ;;  %v43_v5 = vld [vmem:[%s893_s1 + $0xd8] sm:$0xff] }
   0x3   :  { %92 = vmatpush1.msra.mxu0 %v44_v2  ;;  %163 = vmatpush1.msra.mxu1 %v46_v3  ;;  %v40_v6 = vld [vmem:[%s893_s1 + $0xc0] sm:$0xff]  ;;  %v42_v7 = vld [vmem:[%s893_s1 + $0xd0] sm:$0xff]  ;;  %v37_v8 = vld [vmem:[%s893_s1 + $0xa8] sm:$0xff] }
   0x4   :  { %93 = vmatprep.subr.mxu0 %v41_v4  ;;  %164 = vmatprep.subr.mxu1 %v43_v5  ;;  %v39_v9 = vld [vmem:[%s893_s1 + $0xb8] sm:$0xff]  ;;  %v36_v10 = vld [vmem:[%s893_s1 + $0xa0] sm:$0xff]  ;;  %v38_v11 = vld [vmem:[%s893_s1 + $0xb0] sm:$0xff] }
   0x5   :  { %94 = vmatpush1.msra.mxu0 %v40_v6  ;;  %165 = vmatpush1.msra.mxu1 %v42_v7  ;;  %v33_v12 = vld [vmem:[%s893_s1 + $0x88] sm:$0xff]  ;;  %v35_v13 = vld [vmem:[%s893_s1 + $0x98] sm:$0xff]  ;;  %v32_v14 = vld [vmem:[%s893_s1 + $0x80] sm:$0xff] }
   0x6   :  { %95 = vmatprep.subr.mxu0 %v37_v8  ;;  %166 = vmatprep.subr.mxu1 %v39_v9  ;;  %v34_v15 = vld [vmem:[%s893_s1 + $0x90] sm:$0xff]  ;;  %v29_v16 = vld [vmem:[%s893_s1 + $0x68] sm:$0xff]  ;;  %v31_v17 = vld [vmem:[%s893_s1 + $0x78] sm:$0xff] }
   0x7   :  { %96 = vmatpush1.msra.mxu0 %v36_v10  ;;  %167 = vmatpush1.msra.mxu1 %v38_v11  ;;  %v28_v18 = vld [vmem:[%s893_s1 + $0x60] sm:$0xff]  ;;  %v30_v19 = vld [vmem:[%s893_s1 + $0x70] sm:$0xff]  ;;  %v25_v20 = vld [vmem:[%s893_s1 + $0x48] sm:$0xff] }
   0x8   :  { %97 = vmatprep.subr.mxu0 %v33_v12  ;;  %168 = vmatprep.subr.mxu1 %v35_v13  ;;  %v27_v21 = vld [vmem:[%s893_s1 + $0x58] sm:$0xff]  ;;  %v24_v22 = vld [vmem:[%s893_s1 + $0x40] sm:$0xff]  ;;  %v26_v23 = vld [vmem:[%s893_s1 + $0x50] sm:$0xff] }
   0x9   :  { %98 = vmatpush1.msra.mxu0 %v32_v14  ;;  %169 = vmatpush1.msra.mxu1 %v34_v15  ;;  %v21_v24 = vld [vmem:[%s893_s1 + $0x28] sm:$0xff]  ;;  %v23_v25 = vld [vmem:[%s893_s1 + $0x38] sm:$0xff]  ;;  %v20_v26 = vld [vmem:[%s893_s1 + $0x20] sm:$0xff] }
   0xa   :  { %99 = vmatprep.subr.mxu0 %v29_v16  ;;  %170 = vmatprep.subr.mxu1 %v31_v17  ;;  %v22_v27 = vld [vmem:[%s893_s1 + $0x30] sm:$0xff]  ;;  %v17_v28 = vld [vmem:[%s893_s1 + $0x8] sm:$0xff]  ;;  %v19_v29 = vld [vmem:[%s893_s1 + $0x18] sm:$0xff] }
   0xb   :  { %100 = vmatpush1.msra.mxu0 %v28_v18  ;;  %171 = vmatpush1.msra.mxu1 %v30_v19  ;;  %v16_v30 = vld [vmem:[%s893_s1] sm:$0xff]  ;;  %v18_v31 = vld [vmem:[%s893_s1 + $0x10] sm:$0xff]  ;;  %v252_v34 = vld [vmem:[%s894_s2 + $0xf8] sm:$0xff] }
   0xc   :  { %101 = vmatprep.subr.mxu0 %v25_v20  ;;  %172 = vmatprep.subr.mxu1 %v27_v21  ;;  %v15_v32 = vld [vmem:[%s892_s0] sm:$0xff]  ;;  %v284_v35 = vld [vmem:[%s894_s2 + $0x1f8] sm:$0xff]  ;;  %v251_v38 = vld [vmem:[%s894_s2 + $0xf0] sm:$0xff] }
   0xd   :  { %102 = vmatpush1.msra.mxu0 %v24_v22  ;;  %173 = vmatpush1.msra.mxu1 %v26_v23  ;;  %v236_v36 = vld [vmem:[%s894_s2 + $0x78] sm:$0xff]  ;;  %v283_v39 = vld [vmem:[%s894_s2 + $0x1f0] sm:$0xff]  ;;  %v250_v42 = vld [vmem:[%s894_s2 + $0xe8] sm:$0xff] }
   0xe   :  { %103 = vmatprep.subr.mxu0 %v21_v24  ;;  %174 = vmatprep.subr.mxu1 %v23_v25  ;;  %v268_v37 = vld [vmem:[%s894_s2 + $0x178] sm:$0xff]  ;;  %v235_v40 = vld [vmem:[%s894_s2 + $0x70] sm:$0xff]  ;;  %v282_v43 = vld [vmem:[%s894_s2 + $0x1e8] sm:$0xff] }
   0xf   :  { %104 = vmatpush1.msra.mxu0 %v20_v26  ;;  %175 = vmatpush1.msra.mxu1 %v22_v27  ;;  %v267_v41 = vld [vmem:[%s894_s2 + $0x170] sm:$0xff]  ;;  %v234_v44 = vld [vmem:[%s894_s2 + $0x68] sm:$0xff]  ;;  %v249_v46 = vld [vmem:[%s894_s2 + $0xe0] sm:$0xff] }
  0x10   :  { %105 = vmatprep.subr.mxu0 %v17_v28  ;;  %176 = vmatprep.subr.mxu1 %v19_v29  ;;  %v266_v45 = vld [vmem:[%s894_s2 + $0x168] sm:$0xff]  ;;  %v281_v47 = vld [vmem:[%s894_s2 + $0x1e0] sm:$0xff]  ;;  %v248_v50 = vld [vmem:[%s894_s2 + $0xd8] sm:$0xff] }
  0x11   :  { %106 = vmatpush1.msra.mxu0 %v16_v30  ;;  %177 = vmatpush1.msra.mxu1 %v18_v31  ;;  %v233_v48 = vld [vmem:[%s894_s2 + $0x60] sm:$0xff]  ;;  %v280_v51 = vld [vmem:[%s894_s2 + $0x1d8] sm:$0xff]  ;;  %v247_v54 = vld [vmem:[%s894_s2 + $0xd0] sm:$0xff] }
  0x12   :  { %465 = vmatmul.mubr.msk.f32.vlgmr.msra.gmra.mxu0 %vm71_vm0, %v15_v32  ;;  %466 = vmatmul.mubr.msk.f32.vlgmr.msra.gmra.mxu1 %vm71_vm0, %v15_v32  ;;  %v265_v49 = vld [vmem:[%s894_s2 + $0x160] sm:$0xff]  ;;  %v232_v52 = vld [vmem:[%s894_s2 + $0x58] sm:$0xff]  ;;  %v279_v55 = vld [vmem:[%s894_s2 + $0x1d0] sm:$0xff] }
  0x13   :  { %467 = vmatprep.subr.mxu0 %v252_v34  ;;  %502 = vmatprep.subr.mxu1 %v284_v35  ;;  %v264_v53 = vld [vmem:[%s894_s2 + $0x158] sm:$0xff]  ;;  %v231_v56 = vld [vmem:[%s894_s2 + $0x50] sm:$0xff] }
  0x14   :  { %468 = vmatpush3.msra.mxu0 %v236_v36  ;;  %503 = vmatpush3.msra.mxu1 %v268_v37  ;;  %v263_v57 = vld [vmem:[%s894_s2 + $0x150] sm:$0xff] }
  0x15   :  { %469 = vmatprep.subr.mxu0 %v251_v38  ;;  %504 = vmatprep.subr.mxu1 %v283_v39 }
  0x16   :  { %470 = vmatpush3.msra.mxu0 %v235_v40  ;;  %505 = vmatpush3.msra.mxu1 %v267_v41 }
  0x17   :  { %471 = vmatprep.subr.mxu0 %v250_v42  ;;  %506 = vmatprep.subr.mxu1 %v282_v43 }
  0x18   :  { %472 = vmatpush3.msra.mxu0 %v234_v44  ;;  %507 = vmatpush3.msra.mxu1 %v266_v45 }
  0x19   :  { %473 = vmatprep.subr.mxu0 %v249_v46  ;;  %508 = vmatprep.subr.mxu1 %v281_v47 }
  0x1a   :  { %474 = vmatpush3.msra.mxu0 %v233_v48  ;;  %509 = vmatpush3.msra.mxu1 %v265_v49 }
  0x1b   :  { %475 = vmatprep.subr.mxu0 %v248_v50  ;;  %510 = vmatprep.subr.mxu1 %v280_v51 }
  0x1c   :  { %8 = vsyncpa [#allocation3], 0  ;;  %476 = vmatpush3.msra.mxu0 %v232_v52  ;;  %511 = vmatpush3.msra.mxu1 %v264_v53  ;;  %v246_v58 = vld [vmem:[%s894_s2 + $0xc8] sm:$0xff]  ;;  %v245_v62 = vld [vmem:[%s894_s2 + $0xc0] sm:$0xff]  ;;  %v51_v34 = vlaneseq  ;;  %vm430_vm1 = vcmask 261120   ;;  %s565_s19 = smov [#allocation2]  }
  0x1d   :  { %v278_v59 = vld [vmem:[%s894_s2 + $0x1c8] sm:$0xff]  ;;  %477 = vmatprep.subr.mxu0 %v247_v54  ;;  %512 = vmatprep.subr.mxu1 %v279_v55  ;;  %v277_v63 = vld [vmem:[%s894_s2 + $0x1c0] sm:$0xff]  ;;  %v244_v2 = vld [vmem:[%s894_s2 + $0xb8] sm:$0xff]  ;;  %s456_s20 = sshll.u32 %s565_s19, 4  ;;  %vm448_vm2 = vcmask 57344   ;;  %s457_s20 = int_to_ptr.vmem [resolvable:$true] %s456_s20 }
  0x1e   :  { %v230_v60 = vld [vmem:[%s894_s2 + $0x48] sm:$0xff]  ;;  %478 = vmatpush3.msra.mxu0 %v231_v56  ;;  %513 = vmatpush3.msra.mxu1 %v263_v57  ;;  %v229_v0 = vld [vmem:[%s894_s2 + $0x40] sm:$0xff]  ;;  %v276_v3 = vld [vmem:[%s894_s2 + $0x1b8] sm:$0xff]  ;;  %v52_v35 = vshrl.u32 %v51_v34, 7  ;;  %v564_v57 = vmov 0   ;;  %s541_s21 = scalar_lea.vmem %s457_s20, 16  ;;  %p546_p1 = scmp.lt.s32.totalorder %s457_s20, %s457_s20 }
  0x1f   :  { %v262_v61 = vld [vmem:[%s894_s2 + $0x148] sm:$0xff]  ;;  %479 = vmatprep.subr.mxu0 %v246_v58  ;;  %514 = vmatprep.subr.mxu1 %v278_v59  ;;  %v261_v1 = vld [vmem:[%s894_s2 + $0x140] sm:$0xff]  ;;  %v228_v4 = vld [vmem:[%s894_s2 + $0x38] sm:$0xff]  ;;  %p542_p0 = scmp.ne.s32.totalorder %s457_s20, %s541_s21  ;;  %s545_s22 = scalar_lea.vmem %s457_s20, 32 }
  0x20   :  { %480 = vmatpush3.msra.mxu0 %v230_v60  ;;  %515 = vmatpush3.msra.mxu1 %v262_v61  ;;  %v260_v5 = vld [vmem:[%s894_s2 + $0x138] sm:$0xff]  ;;  %v243_v6 = vld [vmem:[%s894_s2 + $0xb0] sm:$0xff]  ;;  %v242_v10 = vld [vmem:[%s894_s2 + $0xa8] sm:$0xff]  ;;  %v61_v36 = vsub.s32 2, %v52_v35  ;;  %v53_v37 = vsub.s32 0, %v52_v35  ;;  %v57_v39 = vsub.s32 1, %v52_v35  ;;  %p547_p2 = scmp.lt.s32.totalorder %s545_s22, %s541_s21 }
  0x21   :  { %481 = vmatprep.subr.mxu0 %v245_v62  ;;  %516 = vmatprep.subr.mxu1 %v277_v63  ;;  %v275_v7 = vld [vmem:[%s894_s2 + $0x1b0] sm:$0xff]  ;;  %v274_v11 = vld [vmem:[%s894_s2 + $0x1a8] sm:$0xff]  ;;  %v241_v14 = vld [vmem:[%s894_s2 + $0xa0] sm:$0xff]  ;;  %v65_v40 = vsub.s32 3, %v52_v35 }
  0x22   :  { %482 = vmatpush3.msra.mxu0 %v229_v0  ;;  %517 = vmatpush3.msra.mxu1 %v261_v1  ;;  %v227_v8 = vld [vmem:[%s894_s2 + $0x30] sm:$0xff]  ;;  %v226_v12 = vld [vmem:[%s894_s2 + $0x28] sm:$0xff]  ;;  %v273_v15 = vld [vmem:[%s894_s2 + $0x1a0] sm:$0xff]  ;;  %p548_p3 = por %p547_p2, %p546_p1 }
  0x23   :  { %483 = vmatprep.subr.mxu0 %v244_v2  ;;  %518 = vmatprep.subr.mxu1 %v276_v3  ;;  %v259_v9 = vld [vmem:[%s894_s2 + $0x130] sm:$0xff]  ;;  %v258_v13 = vld [vmem:[%s894_s2 + $0x128] sm:$0xff]  ;;  %v225_v16 = vld [vmem:[%s894_s2 + $0x20] sm:$0xff] }
  0x24   :  { %484 = vmatpush3.msra.mxu0 %v228_v4  ;;  %519 = vmatpush3.msra.mxu1 %v260_v5  ;;  %v257_v17 = vld [vmem:[%s894_s2 + $0x120] sm:$0xff]  ;;  %v240_v18 = vld [vmem:[%s894_s2 + $0x98] sm:$0xff]  ;;  %v239_v22 = vld [vmem:[%s894_s2 + $0x90] sm:$0xff]  ;;  %p549_p4 = pnand %p548_p3, %p542_p0 }
  0x25   :  { %485 = vmatprep.subr.mxu0 %v243_v6  ;;  %520 = vmatprep.subr.mxu1 %v275_v7  ;;  %v272_v19 = vld [vmem:[%s894_s2 + $0x198] sm:$0xff]  ;;  %v271_v23 = vld [vmem:[%s894_s2 + $0x190] sm:$0xff]  ;;  %v238_v26 = vld [vmem:[%s894_s2 + $0x88] sm:$0xff] }
  0x26   :  { %486 = vmatpush3.msra.mxu0 %v227_v8  ;;  %521 = vmatpush3.msra.mxu1 %v259_v9  ;;  %v224_v20 = vld [vmem:[%s894_s2 + $0x18] sm:$0xff]  ;;  %v223_v24 = vld [vmem:[%s894_s2 + $0x10] sm:$0xff]  ;;  %v270_v27 = vld [vmem:[%s894_s2 + $0x188] sm:$0xff]  ;;  %v442_v8 = vand.u32 127, %v51_v34 }
  0x27   :  { %487 = vmatprep.subr.mxu0 %v242_v10  ;;  %522 = vmatprep.subr.mxu1 %v274_v11  ;;  %v256_v21 = vld [vmem:[%s894_s2 + $0x118] sm:$0xff]  ;;  %v255_v25 = vld [vmem:[%s894_s2 + $0x110] sm:$0xff]  ;;  %v222_v28 = vld [vmem:[%s894_s2 + $0x8] sm:$0xff] }
  0x28   :  { %488 = vmatpush3.msra.mxu0 %v226_v12  ;;  %523 = vmatpush3.msra.mxu1 %v258_v13  ;;  %v254_v29 = vld [vmem:[%s894_s2 + $0x108] sm:$0xff]  ;;  %v237_v30 = vld [vmem:[%s894_s2 + $0x80] sm:$0xff]  ;;  %v445_v10 = vsub.s32 %v442_v8, %v52_v35 }
  0x29   :  { %489 = vmatprep.subr.mxu0 %v241_v14  ;;  %524 = vmatprep.subr.mxu1 %v273_v15  ;;  %v269_v31 = vld [vmem:[%s894_s2 + $0x180] sm:$0xff] }
  0x2a   :  { %490 = vmatpush3.msra.mxu0 %v225_v16  ;;  %525 = vmatpush3.msra.mxu1 %v257_v17  ;;  %v221_v32 = vld [vmem:[%s894_s2] sm:$0xff] }
  0x2b   :  { %491 = vmatprep.subr.mxu0 %v240_v18  ;;  %526 = vmatprep.subr.mxu1 %v272_v19  ;;  %v253_v33 = vld [vmem:[%s894_s2 + $0x100] sm:$0xff] }
  0x2c   :  { %492 = vmatpush3.msra.mxu0 %v224_v20  ;;  %527 = vmatpush3.msra.mxu1 %v256_v21  ;;  %v464_v38 = vld [vmem:[%s893_s1 + $0x100] ss:$8 sm:$0xf]  ;;  %v285_v60 = vld [vmem:[%s893_s1 + $0x101] ss:$0 sm:$0xff] }
  0x2d   :  { %493 = vmatprep.subr.mxu0 %v239_v22  ;;  %528 = vmatprep.subr.mxu1 %v271_v23  ;;  %v62_v41 = vrot.slane %v464_v38, %v61_v36  ;;  %v54_v42 = vrot.slane %v464_v38, %v53_v37  ;;  %v58_v43 = vrot.slane %v464_v38, %v57_v39  ;;  %v427_v3 = vld [vmem:[%s893_s1 + $0x102] ss:$0 sm:$0xff]  ;;  %v428_v7 = vld [vmem:[%s893_s1 + $0x103] ss:$0 sm:$0xff] }
  0x2e   :  { %494 = vmatpush3.msra.mxu0 %v223_v24  ;;  %529 = vmatpush3.msra.mxu1 %v255_v25  ;;  %v66_v44 = vrot.slane %v464_v38, %v65_v40 }
  0x2f   :  { %495 = vmatprep.subr.mxu0 %v238_v26  ;;  %530 = vmatprep.subr.mxu1 %v270_v27 }
  0x30   :  { %496 = vmatpush3.msra.mxu0 %v222_v28  ;;  %531 = vmatpush3.msra.mxu1 %v254_v29 }
  0x31   :  { %497 = vmatprep.subr.mxu0 %v237_v30  ;;  %532 = vmatprep.subr.mxu1 %v269_v31 }
  0x32   :  { %498 = vmatpush3.msra.mxu0 %v221_v32  ;;  %533 = vmatpush3.msra.mxu1 %v253_v33 }
  0x33   :  { %540 = vset.pattern.permute.xlu0 %v564_v57 }
  0xd2   :  { %v141_v45 = vpop.f32.mrf.mxu0  ;;  %v212_v46 = vpop.f32.mrf.mxu1 }
  0xd3   :  { %v213_v47 = vadd.f32 %v212_v46, %v62_v41  ;;  %v142_v48 = vadd.f32 %v141_v45, %v54_v42 }
  0xd4   :  { %v143_v49 = vpop.f32.mrf.mxu0  ;;  %v214_v50 = vpop.f32.mrf.mxu1 }
  0xd5   :  { %v144_v51 = vadd.f32 %v143_v49, %v58_v43  ;;  %v215_v52 = vadd.f32 %v214_v50, %v66_v44  ;;  %v219_v53 = vmax.f32 %v213_v47, 0.0  ;;  %v217_v56 = vmax.f32 %v142_v48, 0.0 }
  0xd7   :  { %v218_v54 = vmax.f32 %v144_v51, 0.0  ;;  %v220_v55 = vmax.f32 %v215_v52, 0.0 }
  0xd9   :  { %350 = vmatprep.mubr.f32.mxu0 %v218_v54  ;;  %420 = vmatprep.mubr.f32.mxu1 %v220_v55 }
  0xda   :  { %351 = vmatmul.mubr.f32.vlgmr.msra.gmra.mxu0 %v217_v56  ;;  %421 = vmatmul.mubr.f32.vlgmr.msra.gmra.mxu1 %v219_v53 }
 0x19a   :  { %v499_v58 = vpop.f32.mrf.mxu0  ;;  %v534_v59 = vpop.f32.mrf.mxu1 }
 0x19c   :  { %v500_v61 = vpop.f32.mrf.mxu0  ;;  %v535_v62 = vpop.f32.mrf.mxu1 }
 0x19d   :  { %v501_v63 = vadd.f32 %v500_v61, %v499_v58  ;;  %v536_v1 = vadd.f32 %v535_v62, %v534_v59 }
 0x19f   :  { %v353_v0 = vadd.f32 %v501_v63, %v285_v60 }
 0x1a1   :  { %v423_v2 = vadd.f32 %v536_v1, %v353_v0 }
 0x1a3   :  { %v426_v4 = vmax.f32 %v423_v2, 0.0 }
 0x1a5   :  { %v429_v5 = vmul.f32 %v427_v3, %v426_v4 }
 0x1a7   :  { %v431_v6 = vsel %vm430_vm1, %v429_v5, 0.0 }
 0x1a8   :  { %432 = vadd.xlane.f32.xlu0 %v431_v6 }
 0x1be   :  { %436 = vperm.xlu0 %540, %v428_v7  }
 0x231   :  { %v433_v9 = vpop.xlane.xlu0 %432 }
 0x239   :  { %v437_v11 = vpop.permute.xlu0 %436 }
 0x23a   :  { %v439_v12 = vadd.f32 %v437_v11, %v433_v9 }
 0x23c   :  { %v446_v13 = vrot.slane %v439_v12, %v445_v10 }
 0x23e   :  { %449 = vst.msk [vmem:[#allocation2] sm:$0x1] %vm448_vm2, %v446_v13 }
 0x23f   :  { %552 = shalt.err (!%p549_p4)
}
 0x240   :  { %459 = dma.vmem_to_hbm [thread:$0]  %s457_s20, 16, %s895_s3, [#allocation3]  }
 0x241   :  { %561 = dma.done.wait [#allocation3], 16  }
 0x242   :  { %562 = vsyncadd [#allocation3], 4294967280 }
 0x243   :  { %463 = vsyncpa [#allocation3], 1 }

</bundles_post_ra>
